<compile_context>
chip_gen: v5e
topology: v5e:2x2
jax: 0.10.0
libtpu: 0.0.40
codegen_flags: <defaults>
</compile_context>

<pallas_src>
import functools
import math

import jax
import jax.numpy as jnp
from jax.experimental import pallas as pl
from jax.experimental.pallas import tpu as pltpu


def _attn_kernel(x_ref, wt_ref, b_ref, o_ref, *, scale, layers):
    # x_ref: (Bb, S, D) bf16; wt_ref: (D, D) bf16 pre-transposed (in, out);
    # b_ref: (1, D) f32; o_ref: (Bb, S, D) in the caller's dtype.
    Bb, S, D = x_ref.shape

    # --- Linear: fold batch into MXU rows: (Bb*S, D) @ (D, D), bf16 -> f32 ---
    # (Bb,S,D)->(Bb*S,D) keeps the last dim, i.e. a free sublane retile
    # (the block picker keeps S a multiple of 8 for this path).
    x2 = x_ref[...].reshape(Bb * S, D)
    v = jnp.dot(x2, wt_ref[...], preferred_element_type=jnp.float32)
    v = v + b_ref[...].astype(jnp.float32)
    v = v.reshape(Bb, S, D)                                       # f32

    inv_scale = 1.0 / scale             # 1/sqrt(D)
    op_scale = 1.0 / math.sqrt(scale)   # D**-0.25 (operand pre-scale path)

    def layer_body(v):
        vb = v.astype(jnp.bfloat16)                               # (Bb, S, D)
        if S > D:
            # Pre-scale the (smaller) (S,D) operand once; identical scaled
            # bf16 operand on both MXU sides keeps u exactly symmetric in fp.
            vs = (v * op_scale).astype(jnp.bfloat16)
            u = jnp.einsum("bsd,btd->bst", vs, vs,
                           preferred_element_type=jnp.float32)    # (Bb, S, S)
            cm = jnp.max(u, axis=-2, keepdims=True)               # (Bb, 1, S)
            p = jnp.exp(u - cm)
        else:
            # S <= D: skip the scaled copy entirely; fold 1/sqrt(D) into the
            # exp argument. A scalar scale of symmetric u stays symmetric.
            u = jnp.einsum("bsd,btd->bst", vb, vb,
                           preferred_element_type=jnp.float32)    # (Bb, S, S)
            cm = jnp.max(u, axis=-2, keepdims=True)               # (Bb, 1, S)
            p = jnp.exp((u - cm) * inv_scale)
        # attn^T directly: u is symmetric, so the transpose of the row softmax
        # equals the column softmax (axis=-2). No SxS transpose; EUP divide.
        cl = jnp.sum(p, axis=-2, keepdims=True)                   # (Bb, 1, S)
        attn_t = p * pl.reciprocal(cl, approx=True)
        # v_new = attn^T @ v : plain NN batched matmul, bf16 -> f32 on MXU.
        return jnp.einsum("bst,btd->bsd", attn_t.astype(jnp.bfloat16), vb,
                          preferred_element_type=jnp.float32)     # (Bb, S, D)

    # TODO(synk): add a KV-tiled (flash-style) online-softmax path once S
    # approaches ~1K; the f32 (S,S) temporaries (~12*S^2*Bb bytes) would
    # otherwise cap Bb / OOM first on v7x's 64 MiB VMEM.
    if layers <= 4:
        for _ in range(layers):          # static unroll: LLO sees across layers
            v = layer_body(v)
    else:
        v = jax.lax.fori_loop(0, layers, lambda _, vv: layer_body(vv), v)

    o_ref[...] = v.astype(o_ref.dtype)


def _tpu_memory_model():
    """Best-effort (physical VMEM bytes per core, is_v7x). Safe fallbacks."""
    kind = ""
    try:
        kind = jax.devices()[0].device_kind.lower()
    except Exception:
        pass
    is_v7x = "v7" in kind
    vmem = 0
    try:
        vmem = int(pltpu.get_tpu_info().vmem_capacity_bytes)
    except Exception:
        vmem = 0
    if vmem <= 0:
        # v7x: 64 MiB per TC; v4/v5e/v6e: 128 MiB; unknown: conservative 64 MiB.
        vmem = (64 << 20) if (is_v7x or not kind) else (128 << 20)
    if is_v7x:
        vmem = min(vmem, 64 << 20)
    vmem = min(vmem, 128 << 20)
    return vmem, is_v7x


def _block_footprint_bytes(bb, S, D):
    """Conservative VMEM bytes for one grid step with batch block bb."""
    in_blk = bb * S * D * 2              # bf16 activation block
    out_blk = bb * S * D * 4             # f32 output block
    dbuf = 2 * (in_blk + out_blk)        # Pallas double-buffers each stream
    params = 2 * (D * D * 2 + D * 4)     # weight (bf16) + bias (f32), x2 bufs
    # Live in-kernel temporaries per layer step (worst case):
    #   v (f32) + vb (bf16) + next v (f32)  -> ~10 B/elem over (bb, S, D)
    #   u/p (f32) + attn_t (f32 + bf16)     -> ~12 B/elem over (bb, S, S)
    tmps = bb * (10 * S * D + 12 * S * S)
    return dbuf + params + tmps


def _pick_batch_block(B, S, D, vmem_budget_bytes, *, want_two_steps):
    """Largest divisor of B whose per-step footprint fits the VMEM budget."""
    if S % 8 != 0:
        # Keep the in-kernel (Bb*S, D) fold a pure sublane retile.
        return 1
    cap = B
    if want_two_steps and B >= 2:
        cap = B // 2                     # keep >= 2 parallel grid steps (2 TCs)
    best = 1
    for bb in range(1, cap + 1):
        if B % bb:
            continue
        if _block_footprint_bytes(bb, S, D) <= vmem_budget_bytes:
            best = bb
    return best


@functools.partial(jax.jit, static_argnames=("layers",))
def scaled_dot_product_attention(q, weight, bias, *, layers=1):
    """q: (B, S, D); weight: (D, D) PyTorch layout (out, in); bias: (D,)."""
    B, S, D = q.shape
    out_dtype = q.dtype
    scale = math.sqrt(D)

    # bf16 on the wire: the kernel computes in bf16 anyway, so casting before
    # the DMA halves HBM->VMEM bytes for the dominant streams. Bias stays f32.
    q_bf = q.astype(jnp.bfloat16)
    wt = weight.T.astype(jnp.bfloat16)           # one-time host-side transpose
    bias2d = bias.reshape(1, D).astype(jnp.float32)

    vmem_physical, is_v7x = _tpu_memory_model()
    vmem_budget = (vmem_physical * 5) // 16      # ~31% of physical per step
    vmem_limit = (vmem_physical * 3) // 4        # raise scoped VMEM to match

    Bb = _pick_batch_block(B, S, D, vmem_budget, want_two_steps=is_v7x)

    kernel = functools.partial(_attn_kernel, scale=scale, layers=layers)

    return pl.pallas_call(
        kernel,
        out_shape=jax.ShapeDtypeStruct((B, S, D), out_dtype),
        grid_spec=pltpu.PrefetchScalarGridSpec(
            num_scalar_prefetch=0,
            grid=(B // Bb,),
            in_specs=[
                pl.BlockSpec((Bb, S, D), lambda b: (b, 0, 0)),   # activations
                pl.BlockSpec((D, D), lambda b: (0, 0)),          # W^T (in,out)
                pl.BlockSpec((1, D), lambda b: (0, 0)),          # bias
            ],
            out_specs=pl.BlockSpec((Bb, S, D), lambda b: (b, 0, 0)),
        ),
        compiler_params=pltpu.CompilerParams(
            dimension_semantics=("parallel",),
            vmem_limit_bytes=int(vmem_limit),
        ),
    )(q_bf, wt, bias2d)


def _reference(q, weight, bias, *, layers=1):
    """Pure-JAX f32 reference mirroring the PyTorch forward."""
    D = q.shape[-1]
    scale = math.sqrt(D)
    v = q @ weight.T + bias
    for _ in range(layers):
        u = jnp.einsum("bsd,btd->bst", v, v) / scale
        attn = jax.nn.softmax(u, axis=2)
        v = jnp.einsum("bts,btd->bsd", attn, v)    # attn^T @ v per batch
    return v


if __name__ == "__main__":
    B, S, D = 2, 8, 32

    key = jax.random.PRNGKey(0)
    kq, kw, kb = jax.random.split(key, 3)

    q = jax.random.normal(kq, (B, S, D), dtype=jnp.float32)

    # Deterministic nn.Linear(dim, dim)-style init: U(-1/sqrt(in), 1/sqrt(in))
    bound = 1.0 / math.sqrt(D)
    weight = jax.random.uniform(kw, (D, D), jnp.float32, -bound, bound)
    bias = jax.random.uniform(kb, (D,), jnp.float32, -bound, bound)

    out = scaled_dot_product_attention(q, weight, bias, layers=1)
    out = jax.block_until_ready(out)

    ref = _reference(q, weight, bias, layers=1)
    assert out.shape == (B, S, D)
    # Tolerance loosened for bf16-matmul / approx-reciprocal fast path.
    max_err = float(jnp.max(jnp.abs(out - ref)))
    assert max_err < 5e-2, f"mismatch vs reference: max abs err {max_err}"

    print("KERNEL_OK")
</pallas_src>

<mosaic_0001>
module attributes {stable_mosaic.version = 11 : i64} {
  func.func @_attn_kernel(%arg0: i32, %arg1: memref<2x8x32xbf16, #tpu.memory_space<vmem>>, %arg2: memref<32x32xbf16, #tpu.memory_space<vmem>>, %arg3: memref<1x32xf32, #tpu.memory_space<vmem>>, %arg4: memref<2x8x32xf32, #tpu.memory_space<vmem>>) attributes {dimension_semantics = [#tpu.dimension_semantics<parallel>], iteration_bounds = array<i64: 1>, scalar_prefetch = 0 : i64, scratch_operands = 0 : i64, tpu.core_type = #tpu.core_type<tc>, window_params = [{transform_indices = @transform_0, window_bounds = array<i64: 2, 8, 32>}, {pipeline_mode = #tpu.pipeline_mode<synchronous>, transform_indices = @transform_1, window_bounds = array<i64: 32, 32>}, {pipeline_mode = #tpu.pipeline_mode<synchronous>, transform_indices = @transform_2, window_bounds = array<i64: 1, 32>}, {transform_indices = @transform_3, window_bounds = array<i64: 2, 8, 32>}]} {
    %c0 = arith.constant 0 : index
    %c0_0 = arith.constant 0 : index
    %c0_1 = arith.constant 0 : index
    %0 = vector.load %arg1[%c0, %c0_0, %c0_1] : memref<2x8x32xbf16, #tpu.memory_space<vmem>>, vector<2x8x32xbf16>
    %1 = vector.shape_cast %0 : vector<2x8x32xbf16> to vector<16x32xbf16>
    %c0_2 = arith.constant 0 : index
    %c0_3 = arith.constant 0 : index
    %2 = vector.load %arg2[%c0_2, %c0_3] : memref<32x32xbf16, #tpu.memory_space<vmem>>, vector<32x32xbf16>
    %cst = arith.constant dense<0.000000e+00> : vector<16x32xf32>
    %3 = tpu.matmul %1, %2, %cst {dimension_numbers = #tpu.dot_dimension_numbers<[1], [0], [0], [1], [0, 0, 1, 1], [], []>} : vector<16x32xbf16>, vector<32x32xbf16>, vector<16x32xf32> -> vector<16x32xf32>
    %c0_4 = arith.constant 0 : index
    %c0_5 = arith.constant 0 : index
    %4 = vector.load %arg3[%c0_4, %c0_5] : memref<1x32xf32, #tpu.memory_space<vmem>>, vector<1x32xf32>
    %5 = vector.broadcast %4 : vector<1x32xf32> to vector<16x32xf32>
    %6 = arith.addf %3, %5 : vector<16x32xf32>
    %7 = vector.shape_cast %6 : vector<16x32xf32> to vector<2x8x32xf32>
    %8 = arith.truncf %7 : vector<2x8x32xf32> to vector<2x8x32xbf16>
    "tpu.trace_start"() <{level = 10 : i32, message = "bsd,btd->bst"}> : () -> ()
    %cst_6 = arith.constant dense<0.000000e+00> : vector<2x8x8xf32>
    %9 = tpu.matmul %8, %8, %cst_6 {dimension_numbers = #tpu.dot_dimension_numbers<[2], [2], [1], [1], [0, 0, 0, 1, 1, 1], [0], [0]>} : vector<2x8x32xbf16>, vector<2x8x32xbf16>, vector<2x8x8xf32> -> vector<2x8x8xf32>
    "tpu.trace_stop"() : () -> ()
    %cst_7 = arith.constant dense<0xFF800000> : vector<2x8xf32>
    %10 = vector.multi_reduction <maximumf>, %9, %cst_7 [1] : vector<2x8x8xf32> to vector<2x8xf32>
    %11 = vector.shape_cast %10 : vector<2x8xf32> to vector<2x1x8xf32>
    %12 = vector.broadcast %11 : vector<2x1x8xf32> to vector<2x8x8xf32>
    %13 = arith.subf %9, %12 : vector<2x8x8xf32>
    %cst_8 = arith.constant 0.176776692 : f32
    %14 = vector.broadcast %cst_8 : f32 to vector<2x8x8xf32>
    %15 = arith.mulf %13, %14 : vector<2x8x8xf32>
    %16 = math.exp %15 : vector<2x8x8xf32>
    %cst_9 = arith.constant dense<0.000000e+00> : vector<2x8xf32>
    %17 = vector.multi_reduction <add>, %16, %cst_9 [1] : vector<2x8x8xf32> to vector<2x8xf32>
    %18 = vector.shape_cast %17 : vector<2x8xf32> to vector<2x1x8xf32>
    %19 = tpu.reciprocal %18 {approx = true} : vector<2x1x8xf32> -> vector<2x1x8xf32>
    %20 = vector.broadcast %19 : vector<2x1x8xf32> to vector<2x8x8xf32>
    %21 = arith.mulf %16, %20 : vector<2x8x8xf32>
    %22 = arith.truncf %21 : vector<2x8x8xf32> to vector<2x8x8xbf16>
    "tpu.trace_start"() <{level = 10 : i32, message = "bst,btd->bsd"}> : () -> ()
    %cst_10 = arith.constant dense<0.000000e+00> : vector<2x8x32xf32>
    %23 = tpu.matmul %22, %8, %cst_10 {dimension_numbers = #tpu.dot_dimension_numbers<[2], [1], [1], [2], [0, 0, 0, 1, 1, 2], [0], [0]>} : vector<2x8x8xbf16>, vector<2x8x32xbf16>, vector<2x8x32xf32> -> vector<2x8x32xf32>
    "tpu.trace_stop"() : () -> ()
    %c0_11 = arith.constant 0 : index
    %c0_12 = arith.constant 0 : index
    %c0_13 = arith.constant 0 : index
    %24 = vector.load %arg4[%c0_11, %c0_12, %c0_13] : memref<2x8x32xf32, #tpu.memory_space<vmem>>, vector<2x8x32xf32>
    tpu.vector_store %arg4[%c0_11, %c0_12, %c0_13], %23 {strides = array<i32>} : memref<2x8x32xf32, #tpu.memory_space<vmem>>, vector<2x8x32xf32>,
    return
  }
  func.func @transform_0(%arg0: i32) -> (i32, i32, i32) {
    %c0_i32 = arith.constant 0 : i32
    %c0_i32_0 = arith.constant 0 : i32
    %c0_i32_1 = arith.constant 0 : i32
    return %arg0, %c0_i32, %c0_i32_0 : i32, i32, i32
  }
  func.func @transform_1(%arg0: i32) -> (i32, i32) {
    %c0_i32 = arith.constant 0 : i32
    %c0_i32_0 = arith.constant 0 : i32
    %c0_i32_1 = arith.constant 0 : i32
    return %c0_i32, %c0_i32_0 : i32, i32
  }
  func.func @transform_2(%arg0: i32) -> (i32, i32) {
    %c0_i32 = arith.constant 0 : i32
    %c0_i32_0 = arith.constant 0 : i32
    %c0_i32_1 = arith.constant 0 : i32
    return %c0_i32, %c0_i32_0 : i32, i32
  }
  func.func @transform_3(%arg0: i32) -> (i32, i32, i32) {
    %c0_i32 = arith.constant 0 : i32
    %c0_i32_0 = arith.constant 0 : i32
    %c0_i32_1 = arith.constant 0 : i32
    return %arg0, %c0_i32, %c0_i32_0 : i32, i32, i32
  }
}

</mosaic_0001>

<bundles_post_ra>
// kernel: scaled_dot_product_attention.1
= control target key start
LH: loop header
LB: loop body
LE: loop exit
PB: predicated region body
PF: predicated region fallthrough
CT: control target
= control target key end

     0   :  { %s304_s0 = inlined_call_operand.vmem [shape: bf16[2,8,32], index: 0, kind: input, shape index: {}]   ;;  %s305_s1 = inlined_call_operand.vmem [shape: bf16[32,32], index: 1, kind: input, shape index: {}]   ;;  %s306_s2 = inlined_call_operand.vmem [shape: f32[1,32], index: 2, kind: input, shape index: {}]   ;;  %s307_s3 = inlined_call_operand.hbm [shape: f32[2,8,32], index: 3, kind: output, shape index: {}]  }
   0x1   :  { %v214_v0 = vld [vmem:[%s305_s1 + $0x8] sm:$0xff] }
   0x2   :  { %8 = vsyncpa [#allocation3], 0  ;;  %53 = vmatpush.bf16.msra.mxu0 %v214_v0  ;;  %v213_v1 = vld [vmem:[%s305_s1] sm:$0xff]  ;;  %vm43_vm0 = vcmask 261120   ;;  %vm141_vm1 = vcmask 1043456   ;;  %vm95_vm2 = vcmask 64512  }
   0x3   :  { %v212_v2 = vld [vmem:[%s304_s0] sm:$0xff]  ;;  %s253_s0 = smov [#allocation2]   ;;  %s183_s21 = sshll.u32 %s307_s3, 4  ;;  %s184_s21 = int_to_ptr.hbm [resolvable:$true] %s183_s21 }
   0x4   :  { %v218_v3 = vld [vmem:[%s306_s2] ss:$0 sm:$0xff]  ;;  %s181_s1 = sshll.u32 %s253_s0, 4  ;;  %s254_s22 = smov 128   ;;  %s182_s1 = int_to_ptr.vmem [resolvable:$true] %s181_s1 }
   0x5   :  { %s255_s23 = smov 8  }
   0x6   :  { %54 = vmatpush.bf16.msra.mxu0 %v213_v1 }
   0x9   :  { %207 = vmatmul.msk.bf16.vlgmr.msra.gmra.mxu0 %vm43_vm0, %v212_v2 }
  0x86   :  { %v56_v4 = vpop.f32.mrf.mxu0 }
  0x87   :  { %v57_v5 = vadd.f32 %v218_v3, %v56_v4 }
  0x89   :  { %v61_v6 = vpack.c.bf16 %v57_v5, %v57_v5 }
  0x8b   :  { %v64_v7 = vsel %vm43_vm0, %v61_v6, 0  ;;  %v142_v8 = vsel %vm141_vm1, %v61_v6, 0 }
  0x8c   :  { %73 = vmatpush.bf16.xpose.msra.mxu1 %v64_v7  ;;  %151 = vmatpush.bf16.msra.mxu3 %v142_v8 }
  0x8e   :  { %v58_v9 = vpop.f32.mrf.mxu0 }
  0x8f   :  { %v59_v10 = vadd.f32 %v218_v3, %v58_v9 }
  0x91   :  { %v62_v11 = vpack.c.bf16 %v59_v10, %v59_v10 }
  0x93   :  { %208 = vmatmul.msk.bf16.vlgmr.msra.gmra.mxu1 %vm43_vm0, %v61_v6  ;;  %v80_v12 = vsel %vm43_vm0, %v62_v11, 0  ;;  %v160_v13 = vsel %vm141_vm1, %v62_v11, 0 }
  0x94   :  { %89 = vmatpush.bf16.xpose.msra.mxu2 %v80_v12  ;;  %169 = vmatpush.bf16.msrb.mxu3 %v160_v13 }
  0x9b   :  { %209 = vmatmul.msk.bf16.vlgmr.msra.gmra.mxu2 %vm43_vm0, %v62_v11 }
 0x110   :  { %v75_v14 = vpop.f32.mrf.mxu1 }
 0x111   :  { %v96_v15 = vsel %vm95_vm2, %v75_v14, -inf }
 0x112   :  { %v97_v16 = vrot.slane %v96_v15, 4 }
 0x114   :  { %v98_v17 = vmax.f32 %v96_v15, %v97_v16 }
 0x116   :  { %v99_v18 = vrot.slane %v98_v17, 2 }
 0x118   :  { %v100_v19 = vmax.f32 %v98_v17, %v99_v18  ;;  %v77_v20 = vpop.f32.mrf.mxu1 }
 0x11a   :  { %v101_v21 = vrot.slane %v100_v19, 1 }
 0x11c   :  { %v102_v22 = vmax.f32 %v100_v19, %v101_v21 }
 0x11e   :  { %v110_v23 = vsub.f32 %v75_v14, %v102_v22  ;;  %v91_v24 = vpop.f32.mrf.mxu2 }
 0x11f   :  { %v103_v25 = vsel %vm95_vm2, %v91_v24, -inf }
 0x120   :  { %v112_v26 = vmul.f32 0.17677669, %v110_v23  ;;  %v104_v27 = vrot.slane %v103_v25, 4 }
 0x122   :  { %v114_v28 = vmul.f32 1.442695, %v112_v26  ;;  %v105_v29 = vmax.f32 %v103_v25, %v104_v27 }
 0x124   :  { %219 = vpow2.f32 %v114_v28  ;;  %v106_v30 = vrot.slane %v105_v29, 2 }
 0x126   :  { %v107_v31 = vmax.f32 %v105_v29, %v106_v30  ;;  %v93_v32 = vpop.f32.mrf.mxu2 }
 0x128   :  { %v108_v33 = vrot.slane %v107_v31, 1 }
 0x12a   :  { %v220_v34 = vpop.eup %219  ;;  %v109_v35 = vmax.f32 %v107_v31, %v108_v33 }
 0x12b   :  { %v118_v36 = vsel %vm95_vm2, %v220_v34, 0.0 }
 0x12c   :  { %v119_v37 = vrot.slane %v118_v36, 4  ;;  %v111_v38 = vsub.f32 %v91_v24, %v109_v35 }
 0x12e   :  { %v120_v39 = vadd.f32 %v119_v37, %v118_v36  ;;  %v113_v40 = vmul.f32 0.17677669, %v111_v38 }
 0x130   :  { %v121_v41 = vrot.slane %v120_v39, 2  ;;  %v116_v42 = vmul.f32 1.442695, %v113_v40 }
 0x132   :  { %v122_v43 = vadd.f32 %v121_v41, %v120_v39  ;;  %221 = vpow2.f32 %v116_v42 }
 0x134   :  { %v123_v44 = vrot.slane %v122_v43, 1 }
 0x136   :  { %v124_v45 = vadd.f32 %v123_v44, %v122_v43 }
 0x138   :  { %v222_v46 = vpop.eup %221  ;;  %223 = vrcp.f32 %v124_v45 }
 0x139   :  { %v125_v47 = vsel %vm95_vm2, %v222_v46, 0.0 }
 0x13a   :  { %v126_v48 = vrot.slane %v125_v47, 4 }
 0x13c   :  { %v127_v49 = vadd.f32 %v126_v48, %v125_v47 }
 0x13e   :  { %v224_v50 = vpop.eup %223  ;;  %v128_v51 = vrot.slane %v127_v49, 2 }
 0x13f   :  { %v134_v52 = vmul.f32 %v224_v50, %v220_v34 }
 0x140   :  { %v129_v53 = vadd.f32 %v128_v51, %v127_v49 }
 0x141   :  { %v136_v54 = vpack.c.bf16 %v134_v52, %v134_v52 }
 0x142   :  { %v130_v55 = vrot.slane %v129_v53, 1 }
 0x143   :  { %210 = vmatmul.msk.bf16.vlgmr.msra.gmra.mxu3 %vm95_vm2, %v136_v54 }
 0x144   :  { %v131_v56 = vadd.f32 %v130_v55, %v129_v53 }
 0x146   :  { %225 = vrcp.f32 %v131_v56 }
 0x14c   :  { %v226_v57 = vpop.eup %225 }
 0x14d   :  { %v135_v58 = vmul.f32 %v226_v57, %v222_v46 }
 0x14f   :  { %v137_v59 = vpack.c.bf16 %v135_v58, %v135_v58 }
 0x153   :  { %211 = vmatmul.msk.bf16.vlgmr.msrb.gmra.mxu3 %vm95_vm2, %v137_v59 }
 0x1c6   :  { %v153_v60 = vpop.f32.mrf.mxu3 }
 0x1c7   :  { %175 = vst.msk [vmem:[#allocation2] sm:$0xff] %vm43_vm0, %v153_v60 }
 0x1ce   :  { %v155_v61 = vpop.f32.mrf.mxu3 }
 0x1d6   :  { %v171_v62 = vpop.f32.mrf.mxu3 }
 0x1d7   :  { %176 = vst.msk [vmem:[#allocation2 + $0x8] sm:$0xff] %vm43_vm0, %v171_v62 }
 0x1d8   :  { %189 = dma.vmem_to_hbm [thread:$0]  %s182_s1, 256, %s184_s21, [#allocation3], %s254_s22, %s254_s22, %s255_s23  }
 0x1de   :  { %v173_v63 = vpop.f32.mrf.mxu3 }
 0x1df   :  { %251 = dma.done.wait [#allocation3], 256  }
 0x1e0   :  { %252 = vsyncadd [#allocation3], 4294967040 }
 0x1e1   :  { %194 = vsyncpa [#allocation3], 1 }

</bundles_post_ra>
